<compile_context>
chip_gen: v5e
topology: v5e:2x2
jax: 0.10.0
libtpu: 0.0.40
codegen_flags: <defaults>
</compile_context>

<pallas_src>
import jax
import jax.numpy as jnp
from jax.experimental import pallas as pl
from jax.experimental.pallas import tpu as pltpu


def _round_up(x, m):
    return ((x + m - 1) // m) * m


# ----------------------------------------------------------------------------
# Kernels
# ----------------------------------------------------------------------------
def _linear_bias_kernel(x_ref, w_ref, b_ref, o_ref):
    """Single-K-step:  o = x @ w + b  for one (i, j) output tile."""
    w = w_ref[...]
    acc = jnp.dot(x_ref[...].astype(w.dtype), w, preferred_element_type=jnp.float32)
    o_ref[...] = (acc + b_ref[...].astype(jnp.float32)).astype(o_ref.dtype)


def _linear_bias_kernel_ktiled(x_ref, w_ref, b_ref, o_ref, acc_ref):
    """K-tiled variant: f32 accumulator initialized with the bias at k==0."""
    k = pl.program_id(2)

    @pl.when(k == 0)
    def _():
        acc_ref[...] = jnp.broadcast_to(
            b_ref[...].astype(jnp.float32), acc_ref.shape
        )

    w = w_ref[...]
    acc_ref[...] += jnp.dot(
        x_ref[...].astype(w.dtype), w, preferred_element_type=jnp.float32
    )

    @pl.when(k == pl.num_programs(2) - 1)
    def _():
        o_ref[...] = acc_ref[...].astype(o_ref.dtype)


# ----------------------------------------------------------------------------
# Tile selection
# ----------------------------------------------------------------------------
def _choose_tiles(M, K, N, x_itemsize, w_itemsize):
    # Lane-dense output: pad N to a 128 multiple, prefer a single N block.
    N_pad = _round_up(N, 128)
    if N_pad <= 2048:
        tn = N_pad
    else:
        tn = 256
        N_pad = _round_up(N, tn)

    # Cap tm so the double-buffered footprint is portable (v5e scoped 16 MiB,
    # v7x physical 64 MiB).
    tm = min(_round_up(M, 8), 256)
    # v7x megacore: give the parallel M axis >= 2 programs when possible.
    if pl.cdiv(M, tm) == 1 and M > 8:
        tm = _round_up(pl.cdiv(M, 2), 8)
    M_pad = _round_up(M, tm)

    # Fold K entirely when the double-buffered input blocks fit the budget;
    # otherwise tile K in 256 multiples (matches v6e/v7x MXU pass width).
    budget = 8 * 1024 * 1024
    per_k_bytes = 2 * (tm * x_itemsize + tn * w_itemsize)  # per unit of tk
    tk_cap = max(256, (budget // per_k_bytes) // 256 * 256)
    if K <= tk_cap:
        tk, K_pad = K, K
    else:
        tk = tk_cap
        K_pad = _round_up(K, tk)

    return M_pad, K_pad, N_pad, tm, tk, tn


# ----------------------------------------------------------------------------
# Wrapper
# ----------------------------------------------------------------------------
def patch_embed_forward(x, weight_t, bias):
    """y = x @ weight_t + bias over the last axis of x.

    x:        (..., patch_size)
    weight_t: (patch_size, embed_dim)  -- pre-transposed, typically bf16
    bias:     (embed_dim,)
    returns   (..., embed_dim), dtype of x
    """
    K, N = weight_t.shape
    assert x.shape[-1] == K, "last dim of x must equal patch_size"
    lead_shape = x.shape[:-1]

    x2d = x.reshape(-1, K)
    M = x2d.shape[0]
    out_dtype = x.dtype

    M_pad, K_pad, N_pad, tm, tk, tn = _choose_tiles(
        M, K, N, x2d.dtype.itemsize, weight_t.dtype.itemsize
    )

    # Zero-pad operands to the tiled shapes (zeros are neutral for the matmul;
    # padded output rows/cols are sliced off below).
    if (M_pad, K_pad) != (M, K):
        x2d = jnp.pad(x2d, ((0, M_pad - M), (0, K_pad - K)))
    w2d = weight_t
    if (K_pad, N_pad) != (K, N):
        w2d = jnp.pad(w2d, ((0, K_pad - K), (0, N_pad - N)))
    b2d = bias.astype(jnp.float32).reshape(1, N)
    if N_pad != N:
        b2d = jnp.pad(b2d, ((0, 0), (0, N_pad - N)))

    grid_i = M_pad // tm
    grid_j = N_pad // tn
    grid_k = K_pad // tk

    if grid_k == 1:
        # Whole K in one dot: no accumulator scratch, no k axis.
        grid_spec = pltpu.PrefetchScalarGridSpec(
            num_scalar_prefetch=0,
            grid=(grid_i, grid_j),
            in_specs=[
                pl.BlockSpec((tm, K_pad), lambda i, j: (i, 0)),   # x tile
                pl.BlockSpec((K_pad, tn), lambda i, j: (0, j)),   # W^T tile
                pl.BlockSpec((1, tn), lambda i, j: (0, j)),       # bias tile
            ],
            out_specs=pl.BlockSpec((tm, tn), lambda i, j: (i, j)),
            scratch_shapes=[],
        )
        kernel = _linear_bias_kernel
        dims = ("parallel", "parallel")
    else:
        grid_spec = pltpu.PrefetchScalarGridSpec(
            num_scalar_prefetch=0,
            grid=(grid_i, grid_j, grid_k),
            in_specs=[
                pl.BlockSpec((tm, tk), lambda i, j, k: (i, k)),   # x tile
                pl.BlockSpec((tk, tn), lambda i, j, k: (k, j)),   # W^T tile
                pl.BlockSpec((1, tn), lambda i, j, k: (0, j)),    # bias tile
            ],
            out_specs=pl.BlockSpec((tm, tn), lambda i, j, k: (i, j)),
            scratch_shapes=[pltpu.VMEM((tm, tn), jnp.float32)],
        )
        kernel = _linear_bias_kernel_ktiled
        dims = ("parallel", "parallel", "arbitrary")

    out2d = pl.pallas_call(
        kernel,
        out_shape=jax.ShapeDtypeStruct((M_pad, N_pad), out_dtype),
        grid_spec=grid_spec,
        compiler_params=pltpu.CompilerParams(
            dimension_semantics=dims,
            vmem_limit_bytes=32 * 1024 * 1024,
        ),
    )(x2d, w2d, b2d)

    out2d = out2d[:M, :N]
    return out2d.reshape(*lead_shape, N)


# ----------------------------------------------------------------------------
# Module
# ----------------------------------------------------------------------------
class PatchEmbedPallas:
    """JAX/Pallas re-implementation of PatchEmbed (a single nn.Linear)."""

    def __init__(self, patch_size=2048, embed_dim=200,
                 key=jax.random.PRNGKey(0), weight_dtype=jnp.bfloat16):
        k_w, k_b = jax.random.split(key)
        # nn.Linear-style uniform(-1/sqrt(K), 1/sqrt(K)) init.
        bound = 1.0 / (patch_size ** 0.5)
        w = jax.random.uniform(
            k_w, (embed_dim, patch_size), jnp.float32, minval=-bound, maxval=bound
        )
        b = jax.random.uniform(
            k_b, (embed_dim,), jnp.float32, minval=-bound, maxval=bound
        )
        # Pre-transposed, bf16-streamed weight (K, N); bias stays f32.
        self.weight_t = jnp.asarray(w.T, dtype=weight_dtype)
        self.bias = b

    def __call__(self, x):
        return patch_embed_forward(x, self.weight_t, self.bias)


# ----------------------------------------------------------------------------
# Demo / self-check
# ----------------------------------------------------------------------------
if __name__ == "__main__":
    key = jax.random.PRNGKey(0)
    k_x, k_p, k_x2, k_p2 = jax.random.split(key, 4)

    # Small shapes consistent with the module's forward:
    # x: [batch, seq, patch_size] -> y: [batch, seq, embed_dim]
    batch, seq, patch_size, embed_dim = 2, 8, 256, 128
    x = jax.random.normal(k_x, (batch, seq, patch_size), dtype=jnp.float32)
    model = PatchEmbedPallas(patch_size=patch_size, embed_dim=embed_dim, key=k_p)

    y = jax.block_until_ready(model(x))
    assert y.shape == (batch, seq, embed_dim)

    # Reference with identical numerics (bf16 operands, f32 accumulation).
    y_ref = (
        jnp.dot(x.astype(jnp.bfloat16), model.weight_t,
                preferred_element_type=jnp.float32)
        + model.bias
    )
    assert jnp.allclose(y, y_ref, atol=1e-2, rtol=1e-2)

    # Second check: non-128-multiple embed_dim (the class default 200) to
    # exercise the N-padding / lane-dense output path.
    model2 = PatchEmbedPallas(patch_size=256, embed_dim=200, key=k_p2)
    x2 = jax.random.normal(k_x2, (batch, seq, 256), dtype=jnp.float32)
    y2 = jax.block_until_ready(model2(x2))
    assert y2.shape == (batch, seq, 200)
    y2_ref = (
        jnp.dot(x2.astype(jnp.bfloat16), model2.weight_t,
                preferred_element_type=jnp.float32)
        + model2.bias
    )
    assert jnp.allclose(y2, y2_ref, atol=1e-2, rtol=1e-2)

    print("KERNEL_OK")
</pallas_src>

<mosaic_0001>
module attributes {stable_mosaic.version = 11 : i64} {
  func.func @_linear_bias_kernel(%arg0: i32, %arg1: i32, %arg2: memref<8x256xf32, #tpu.memory_space<vmem>>, %arg3: memref<256x128xbf16, #tpu.memory_space<vmem>>, %arg4: memref<1x128xf32, #tpu.memory_space<vmem>>, %arg5: memref<8x128xf32, #tpu.memory_space<vmem>>) attributes {dimension_semantics = [#tpu.dimension_semantics<parallel>, #tpu.dimension_semantics<parallel>], iteration_bounds = array<i64: 2, 1>, scalar_prefetch = 0 : i64, scratch_operands = 0 : i64, tpu.core_type = #tpu.core_type<tc>, window_params = [{transform_indices = @transform_0, window_bounds = array<i64: 8, 256>}, {transform_indices = @transform_1, window_bounds = array<i64: 256, 128>}, {transform_indices = @transform_2, window_bounds = array<i64: 1, 128>}, {transform_indices = @transform_3, window_bounds = array<i64: 8, 128>}]} {
    %c0 = arith.constant 0 : index
    %c0_0 = arith.constant 0 : index
    %0 = vector.load %arg3[%c0, %c0_0] : memref<256x128xbf16, #tpu.memory_space<vmem>>, vector<256x128xbf16>
    %c0_1 = arith.constant 0 : index
    %c0_2 = arith.constant 0 : index
    %1 = vector.load %arg2[%c0_1, %c0_2] : memref<8x256xf32, #tpu.memory_space<vmem>>, vector<8x256xf32>
    %2 = arith.truncf %1 : vector<8x256xf32> to vector<8x256xbf16>
    %cst = arith.constant dense<0.000000e+00> : vector<8x128xf32>
    %3 = tpu.matmul %2, %0, %cst {dimension_numbers = #tpu.dot_dimension_numbers<[1], [0], [0], [1], [0, 0, 1, 1], [], []>} : vector<8x256xbf16>, vector<256x128xbf16>, vector<8x128xf32> -> vector<8x128xf32>
    %c0_3 = arith.constant 0 : index
    %c0_4 = arith.constant 0 : index
    %4 = vector.load %arg4[%c0_3, %c0_4] : memref<1x128xf32, #tpu.memory_space<vmem>>, vector<1x128xf32>
    %5 = vector.broadcast %4 : vector<1x128xf32> to vector<8x128xf32>
    %6 = arith.addf %3, %5 : vector<8x128xf32>
    %c0_5 = arith.constant 0 : index
    %c0_6 = arith.constant 0 : index
    %7 = vector.load %arg5[%c0_5, %c0_6] : memref<8x128xf32, #tpu.memory_space<vmem>>, vector<8x128xf32>
    tpu.vector_store %arg5[%c0_5, %c0_6], %6 {strides = array<i32>} : memref<8x128xf32, #tpu.memory_space<vmem>>, vector<8x128xf32>,
    return
  }
  func.func @transform_0(%arg0: i32, %arg1: i32) -> (i32, i32) {
    %c0_i32 = arith.constant 0 : i32
    %c0_i32_0 = arith.constant 0 : i32
    return %arg0, %c0_i32 : i32, i32
  }
  func.func @transform_1(%arg0: i32, %arg1: i32) -> (i32, i32) {
    %c0_i32 = arith.constant 0 : i32
    %c0_i32_0 = arith.constant 0 : i32
    return %c0_i32, %arg1 : i32, i32
  }
  func.func @transform_2(%arg0: i32, %arg1: i32) -> (i32, i32) {
    %c0_i32 = arith.constant 0 : i32
    %c0_i32_0 = arith.constant 0 : i32
    return %c0_i32, %arg1 : i32, i32
  }
  func.func @transform_3(%arg0: i32, %arg1: i32) -> (i32, i32) {
    %c0_i32 = arith.constant 0 : i32
    return %arg0, %arg1 : i32, i32
  }
}

</mosaic_0001>

<bundles_post_ra>
// kernel: tpu_custom_call.1
= control target key start
LH: loop header
LB: loop body
LE: loop exit
PB: predicated region body
PF: predicated region fallthrough
CT: control target
= control target key end

     0   :  { %8 = vsyncpa [#allocation3], 0  ;;  %s1020_s0 = inlined_call_operand.hbm [shape: f32[16,256], index: 0, kind: input, shape index: {}]   ;;  %s1021_s1 = inlined_call_operand.hbm [shape: bf16[256,128], index: 1, kind: input, shape index: {}]   ;;  %s1022_s2 = inlined_call_operand.vmem [shape: f32[1,128], index: 2, kind: input, shape index: {}]   ;;  %s1023_s3 = inlined_call_operand.hbm [shape: f32[16,128], index: 3, kind: output, shape index: {}]  }
   0x1   :  { %10 = vsyncpa [#allocation3 + $0x1], 0 }
   0x2   :  { %11 = vsyncpa [#allocation6], 0 }
   0x3   :  { %12 = vsyncpa [#allocation4], 0 }
   0x4   :  { %14 = vsyncpa [#allocation4 + $0x1], 0  ;;  %s869_s12 = smov 0   ;;  %s871_s13 = smov 0  }
   0x5   :  { %s873_s14 = smov 0   ;;  %s875_s15 = smov 0  }
   0x6   :  { %s877_s16 = smov 0   ;;  %s879_s17 = smov 0  }
   0x7 LB: > { %s524_s18 = sadd.s32 4294967295, %s844_s17   ;;  %p526_p0 = scmp.ge.s32.totalorder %s844_s17, 1  ;;  %s844_s17 = sphi %s879_s17, %s20_s17   ;;  %s840_s16 = sphi %s877_s16, %s1034_s16   ;;  %s836_s15 = sphi %s875_s15, %s1033_s15   ;;  %s832_s14 = sphi %s873_s14, %s1032_s14   ;;  %s828_s13 = sphi %s871_s13, %s1031_s13   ;;  %s824_s12 = sphi %s869_s12, %s1030_s12  }
   0x8   : > { %p901_p1 = scmp.eq.s32.totalorder %s524_s18, 0  ;;  %p143_p2 = scmp.lt.s32.totalorder %s844_s17, 3 }
   0x9   : > { %s156_s22 = sshll.u32 %s1021_s1, 4  ;;  %s846_s24 = smov [#allocation5]   ;;  %s157_s22 = int_to_ptr.hbm [resolvable:$true] %s156_s22 }
   0xa   : > { %p909_p3 = pnand %p526_p0, %p143_p2  ;;  %s158_s25 = sshll.u32 %s846_s24, 4  ;;  %s159_s25 = int_to_ptr.vmem [resolvable:$true] %s158_s25 }
   0xb   : > { %p529_p6 = scmp.ge.s32.totalorder %s844_s17, 2  ;;  %s847_s26 = smov 64  }
   0xc   : > { %p630_p4 = pneg %p909_p3  ;;  %s848_s27 = smov 4  }
   0xd   : > { %s525_s28 = sadd.s32 4294967294, %s844_s17   ;;  %s32_s29 = sadd.s32 1, %s840_s16 }
   0xe   : > { %p631_p5 = pnand %p630_p4, %p901_p1  ;;  %s39_s30 = sadd.s32 1, %s832_s14 }
   0xf   : > { %p34_p7 = scmp.ge.s32.totalorder %s32_s29, 2  ;;  %p46_p8 = scmp.ne.s32.totalorder %s832_s14, %s828_s13 }
  0x10   : > { %633 = dma.hbm_to_vmem [thread:$0]  (!%p631_p5), %s157_s22, 2048, %s159_s25, [#allocation6], %s847_s26, %s847_s26, %s848_s27  }
  0x11   : > { %p47_p9 = scmp.eq.s32.totalorder %s844_s17, 0  ;;  %p52_p10 = scmp.ne.s32.totalorder %s828_s13, %s824_s12 }
  0x12   : > { %s1036_s29 = smov (%p34_p7, %s32_s29), 0  ;;  %p130_p13 = scmp.eq.s32.totalorder %s524_s18, 1 }
  0x13   : > { %p928_p11 = por %p47_p9, %p46_p8  ;;  %p934_p12 = por %p901_p1, %p52_p10 }
  0x14   : > { %s36_s6 = ssub.s32 %s840_s16, %s1036_s29  ;;  %p136_p2 = scmp.eq.s32.totalorder %s525_s28, 1 }
  0x15   : > { %p37_p0 = scmp.eq.s32.totalorder %s36_s6, 0  ;;  %p940_p4 = por %p130_p13, %p46_p8 }
  0x16   : > { %p643_p5 = scmp.lt.s32.totalorder %s844_s17, 2  ;;  %p948_p7 = por %p136_p2, %p52_p10 }
  0x17   : > { %s946_s8 = scalar_select %p37_p0, %s832_s14, %s39_s30  }
  0x18   : > { %s178_s10 = sand.u32 1, %s832_s14   ;;  %s605_s20 = sshll.u32 %s840_s16, 4 }
  0x19   : > { %s530_s11 = sshll.u32 %s178_s10, 4  ;;  %s187_s18 = scalar_lea.hbm %s1020_s0, %s605_s20 }
  0x1a   : > { %s182_s24 = scalar_lea.vmem [#allocation2], %s530_s11  ;;  %s189_s26 = sshll.u32 %s187_s18, 4  ;;  %s190_s26 = int_to_ptr.hbm [resolvable:$true] %s189_s26 }
  0x1b   : > { %s191_s25 = sshll.u32 %s182_s24, 4  ;;  %p635_p8 = pnand %p643_p5, %p928_p11  ;;  %s192_s25 = int_to_ptr.vmem [resolvable:$true] %s191_s25 }
  0x1c   : > { %s179_s27 = scalar_lea.sflag [#allocation3], %s178_s10  ;;  %200 = sbr.rel (%p909_p3) target bundleno = 203 (0xcb), region = 32 }
  0x1d   : > { %637 = dma.hbm_to_vmem [thread:$0]  (!%p635_p8), %s190_s26, 256, %s192_s25, %s179_s27  }
  0x1e   : > { %s962_s28 = sand.u32 (!%p909_p3), 1, %s828_s13  }
  0x1f   : > { %s534_s30 = sshll.u32 (!%p909_p3), %s962_s28, 4  ;;  %s203_s6 = scalar_lea.sflag (!%p909_p3), [#allocation3], %s962_s28 }
  0x20   : > { %s966_s11 = scalar_lea.vmem (!%p909_p3), [#allocation2], %s534_s30 }
  0x21   : > { %811 = dma.done.wait (%p934_p12), %s203_s6, 256  }
  0x22   : > { %813 = vsyncadd (%p934_p12), %s203_s6, 4294967040 }
  0x23   : > { %815 = dma.done.wait (%p901_p1), [#allocation6], 2048  }
  0x24   : > { %817 = vsyncadd (%p901_p1), [#allocation6], 4294965248  ;;  %v613_v0 = vld [vmem:[#allocation5 + $0x38] sm:$0xff]  ;;  %v612_v2 = vld [vmem:[#allocation5 + $0x30] sm:$0xff]  ;;  %s536_s19 = sshll.u32 %s962_s28, 3  ;;  %s602_s23 = sshll.u32 %s836_s15, 3 }
  0x25   : > { %v621_v1 = vld [vmem:[#allocation5 + $0x78] sm:$0xff]  ;;  %377 = vmatpush.bf16.msra.mxu0 %v613_v0  ;;  %v620_v3 = vld [vmem:[#allocation5 + $0x70] sm:$0xff]  ;;  %v611_v4 = vld [vmem:[#allocation5 + $0x28] sm:$0xff]  ;;  %s416_s21 = scalar_lea.hbm %s1023_s3, %s602_s23  ;;  %s237_s22 = scalar_lea.vmem [#allocation7], %s536_s19 }
  0x26   : > { %390 = vmatpush.bf16.msra.mxu1 %v621_v1  ;;  %v619_v5 = vld [vmem:[#allocation5 + $0x68] sm:$0xff]  ;;  %v610_v6 = vld [vmem:[#allocation5 + $0x20] sm:$0xff]  ;;  %v609_v8 = vld [vmem:[#allocation5 + $0x18] sm:$0xff]  ;;  %s418_s18 = sshll.u32 %s237_s22, 4  ;;  %s420_s24 = sshll.u32 %s416_s21, 4  ;;  %s419_s18 = int_to_ptr.vmem [resolvable:$true] %s418_s18  ;;  %s421_s24 = int_to_ptr.hbm [resolvable:$true] %s420_s24 }
  0x27   : > { %v618_v7 = vld [vmem:[#allocation5 + $0x60] sm:$0xff]  ;;  %v617_v9 = vld [vmem:[#allocation5 + $0x58] sm:$0xff]  ;;  %v608_v10 = vld [vmem:[#allocation5 + $0x10] sm:$0xff]  ;;  %s405_s15 = scalar_lea.sflag [#allocation4], %s962_s28  ;;  %s772_s25 = sshra.s32 %s421_s24, 4  ;;  %s773_s25 = int_to_ptr.hbm [resolvable:$true] %s772_s25 }
  0x28   : > { %v616_v11 = vld [vmem:[#allocation5 + $0x50] sm:$0xff]  ;;  %v607_v12 = vld [vmem:[#allocation5 + $0x8] sm:$0xff]  ;;  %v606_v14 = vld [vmem:[#allocation5] sm:$0xff]  ;;  %s774_s26 = scalar_lea.hbm %s773_s25, 8  ;;  %s778_s6 = scalar_lea.hbm %s1023_s3, 16 }
  0x29   : > { %378 = vmatpush.bf16.msra.mxu0 %v612_v2  ;;  %v615_v13 = vld [vmem:[#allocation5 + $0x48] sm:$0xff]  ;;  %v614_v15 = vld [vmem:[#allocation5 + $0x40] sm:$0xff]  ;;  %p775_p1 = scmp.ne.s32.totalorder %s773_s25, %s774_s26  ;;  %p779_p10 = scmp.lt.s32.totalorder %s773_s25, %s1023_s3 }
  0x2a   : > { %391 = vmatpush.bf16.msra.mxu1 %v620_v3  ;;  %v273_v16 = vld [vmem:[%s966_s11] sm:$0xff]  ;;  %v274_v17 = vld [vmem:[%s966_s11 + $0x8] sm:$0xff]  ;;  %p780_p11 = scmp.lt.s32.totalorder %s778_s6, %s774_s26 }
  0x2b   : > { %v275_v18 = vpack.c.bf16 %v273_v16, %v273_v16  ;;  %v276_v19 = vpack.c.bf16 %v274_v17, %v274_v17  ;;  %v697_v20 = vld [vmem:[%s1022_s2] ss:$0 sm:$0xff]  ;;  %p776_p3 = pnand %p775_p1, %p940_p4 }
  0x2c   : > { %p781_p12 = por %p780_p11, %p779_p10 }
  0x2d   : > { %379 = vmatpush.bf16.msra.mxu0 %v611_v4  ;;  %p777_p9 = pneg %p776_p3 }
  0x2e   : > { %392 = vmatpush.bf16.msra.mxu1 %v619_v5 }
  0x2f   : > { %p782_p13 = pnand %p781_p12, %p777_p9 }
  0x31   : > { %380 = vmatpush.bf16.msra.mxu0 %v610_v6 }
  0x32   : > { %393 = vmatpush.bf16.msra.mxu1 %v618_v7 }
  0x35   : > { %381 = vmatpush.bf16.msra.mxu0 %v609_v8 }
  0x36   : > { %394 = vmatpush.bf16.msra.mxu1 %v617_v9 }
  0x39   : > { %382 = vmatpush.bf16.msra.mxu0 %v608_v10 }
  0x3a   : > { %395 = vmatpush.bf16.msra.mxu1 %v616_v11 }
  0x3d   : > { %383 = vmatpush.bf16.msra.mxu0 %v607_v12 }
  0x3e   : > { %396 = vmatpush.bf16.msra.mxu1 %v615_v13 }
  0x41   : > { %384 = vmatpush.bf16.msra.mxu0 %v606_v14 }
  0x42   : > { %397 = vmatpush.bf16.msra.mxu1 %v614_v15 }
  0x44   : > { %385 = vmatmul.bf16.vlgmr.msra.gmra.mxu0 %v275_v18 }
  0x45   : > { %398 = vmatmul.bf16.vlgmr.msra.gmra.mxu1 %v276_v19 }
  0xc1   : > { %v386_v21 = vpop.f32.mrf.mxu0 }
  0xc2   : > { %v399_v22 = vpop.f32.mrf.mxu1  ;;  %v387_v23 = vadd.f32 %v697_v20, %v386_v21 }
  0xc4   : > { %v400_v24 = vadd.f32 %v399_v22, %v387_v23 }
  0xc6   : > { %403 = vst [vmem:[%s237_s22] sm:$0xff] %v400_v24 }
  0xc7   : > { %785 = shalt.err (!%p782_p13)
}
  0xc8   : > { %628 = dma.vmem_to_hbm [thread:$0]  (%p940_p4), %s419_s18, 128, %s421_s24, %s405_s15  }
  0xc9   : > { %v388_v25 = vpop.f32.mrf.mxu0 }
  0xca   : > { %v401_v26 = vpop.f32.mrf.mxu1 }
  0xcb PF: > { %s432_s28 = sand.u32 1, %s824_s12   ;;  %p639_p0 = pnand %p529_p6, %p948_p7 }
  0xcc   : > { %s433_s23 = scalar_lea.sflag [#allocation4], %s432_s28 }
  0xcd   : > { %p640_p2 = pneg %p639_p0 }
  0xcf   : > { %819 = dma.done.wait (%p640_p2), %s433_s23, 128  }
  0xd0   : > { %821 = vsyncadd (%p640_p2), %s433_s23, 4294967168  ;;  %s20_s17 = sadd.s32 1, %s844_s17   ;;  %s1030_s12 = smov %s828_s13 }
  0xd1   : > { %p17_p5 = scmp.ge.s32.totalorder %s20_s17, 4   ;;  %s1031_s13 = smov %s832_s14 }
  0xd2   : > { %s1032_s14 = smov %s946_s8  ;;  %s1033_s15 = smov %s840_s16 }
  0xd3   : > { %s1034_s16 = smov %s1036_s29  ;;  %19 = sbr.rel (!%p17_p5) target bundleno = 7 (0x7), region = 85 }
  0xd8   :  { %439 = vsyncpa [#allocation3], 1 }
  0xd9   :  { %441 = vsyncpa [#allocation3 + $0x1], 1 }
  0xda   :  { %442 = vsyncpa [#allocation6], 1 }
  0xdb   :  { %443 = vsyncpa [#allocation4], 1 }
  0xdc   :  { %445 = vsyncpa [#allocation4 + $0x1], 1 }

</bundles_post_ra>
